<compile_context>
chip_gen: v6e
topology: v6e:2x2x1
jax: 0.10.0
libtpu: 0.0.40
codegen_flags: <defaults>
</compile_context>

<pallas_src>
import numpy as np
import jax
import jax.numpy as jnp
from jax.experimental import pallas as pl
from jax.experimental.pallas import tpu as pltpu


# ---------------------------------------------------------------------------
# 1-D interpolation matrix (exact torch F.interpolate, align_corners=False)
# ---------------------------------------------------------------------------
def _interp_matrix_1d(out_size: int, in_size: int) -> np.ndarray:
    scale = in_size / out_size
    o = np.arange(out_size, dtype=np.float64)
    src = (o + 0.5) * scale - 0.5
    src = np.maximum(src, 0.0)                      # torch clamps negative coords to 0
    i0 = np.minimum(np.floor(src).astype(np.int64), in_size - 1)
    i1 = np.minimum(i0 + 1, in_size - 1)
    w1 = src - i0
    w0 = 1.0 - w1
    m = np.zeros((out_size, in_size), dtype=np.float64)
    m[np.arange(out_size), i0] += w0
    m[np.arange(out_size), i1] += w1
    return m


# ---------------------------------------------------------------------------
# Kernel 1: fused cbr (BN folded into weight) + ReLU + gate-folded high
#           classifier, evaluated at high resolution, channels-first.
# ---------------------------------------------------------------------------
def _cbr_gate_cls_kernel(high_ref, w1_ref, shift_ref, w2_ref, z_ref):
    """
    high_ref:  (1, C_high, TS_h)       spatial tile of `high`, channels-first
    w1_ref:    (C_inter, C_high)       bn_scale * conv weight
    shift_ref: (C_inter, 1)            folded BN shift (f32)
    w2_ref:    (1, num_classes, C_inter)  per-batch (sigmoid-gate * w_high)
    z_ref:     (1, num_classes, TS_h)  high-branch logits at high resolution
    """
    h = high_ref[0]                                                   # (C_high, TS)
    y = jnp.dot(w1_ref[...], h, preferred_element_type=jnp.float32)   # (C_inter, TS)
    y = jnp.maximum(y + shift_ref[...], 0.0)
    z = jnp.dot(w2_ref[0], y, preferred_element_type=jnp.float32)     # (K, TS)
    z_ref[0] = z.astype(z_ref.dtype)


# ---------------------------------------------------------------------------
# Kernel 2: low classifier + upsampled high branch + merged bias.
# ---------------------------------------------------------------------------
def _low_cls_add_kernel(low_ref, zup_ref, w_low_ref, bias_ref, out_ref):
    """
    low_ref:  (1, C_low, TS_l)
    zup_ref:  (1, num_classes, TS_l)   upsampled high-branch logits (f32)
    w_low_ref:(num_classes, C_low)
    bias_ref: (num_classes, 1)         b_low + b_high (f32)
    out_ref:  (1, num_classes, TS_l)
    """
    o = jnp.dot(w_low_ref[...], low_ref[0], preferred_element_type=jnp.float32)
    o = o + zup_ref[0] + bias_ref[...]
    out_ref[0] = o.astype(out_ref.dtype)


# ---------------------------------------------------------------------------
# Wrapper
# ---------------------------------------------------------------------------
def _spatial_tile(s: int, target: int = 512):
    """Pick a lane-dense spatial tile (multiple of 128) and padded extent."""
    if s <= target:
        return s, s                     # full dim -> always a legal block
    padded = ((s + target - 1) // target) * target
    return target, padded


def _pad_last(x, padded):
    s = x.shape[-1]
    if padded == s:
        return x
    return jnp.pad(x, ((0, 0), (0, 0), (0, padded - s)))


def lraspp_head_forward(low, high, params, *, tile_target=512):
    """low: (N, C_low, Dl, Hl, Wl); high: (N, C_high, Dh, Hh, Wh)
       -> (N, num_classes, Dl, Hl, Wl)"""
    N, C_low, Dl, Hl, Wl = low.shape
    _, C_high, Dh, Hh, Wh = high.shape
    C_inter = params["w_cbr"].shape[0]
    num_classes = params["w_low"].shape[0]
    S_l, S_h = Dl * Hl * Wl, Dh * Hh * Wh
    cdt = high.dtype                        # matmul operand dtype (bf16 ok); acc f32

    # ---- parameter folding (tiny, once, f32) ------------------------------
    eps = 1e-5
    bn_scale = params["bn_gamma"] / jnp.sqrt(params["bn_var"] + eps)        # (C_inter,)
    w1 = (bn_scale[:, None] * params["w_cbr"]).astype(cdt)                  # (C_inter, C_high)
    shift = (params["bn_beta"] - params["bn_mean"] * bn_scale)[:, None]     # (C_inter, 1) f32

    # ---- AdaptiveAvgPool3d(1) + 1x1 conv + sigmoid gate (tiny, plain JAX) --
    pooled = jnp.mean(high.astype(jnp.float32), axis=(2, 3, 4))             # (N, C_high)
    gate = jax.nn.sigmoid(pooled @ params["w_scale"].T.astype(jnp.float32)) # (N, C_inter)
    # fold the per-batch gate into the high classifier weight
    w2 = params["w_high"][None].astype(jnp.float32) * gate[:, None, :]      # (N, K, C_inter)

    # ---- kernel 1: high branch at high resolution --------------------------
    tile_h, S_h_pad = _spatial_tile(S_h, tile_target)
    high_f = _pad_last(high.reshape(N, C_high, S_h), S_h_pad).astype(cdt)

    z = pl.pallas_call(
        _cbr_gate_cls_kernel,
        out_shape=jax.ShapeDtypeStruct((N, num_classes, S_h_pad), jnp.float32),
        grid=(N, S_h_pad // tile_h),
        in_specs=[
            pl.BlockSpec((1, C_high, tile_h), lambda n, t: (n, 0, t)),
            pl.BlockSpec((C_inter, C_high), lambda n, t: (0, 0)),
            pl.BlockSpec((C_inter, 1), lambda n, t: (0, 0)),
            pl.BlockSpec((1, num_classes, C_inter), lambda n, t: (n, 0, 0)),
        ],
        out_specs=pl.BlockSpec((1, num_classes, tile_h), lambda n, t: (n, 0, t)),
        compiler_params=pltpu.CompilerParams(
            dimension_semantics=("parallel", "parallel")),
    )(high_f, w1, shift.astype(jnp.float32), w2)

    # ---- exact separable trilinear upsample (align_corners=False) ----------
    # Only num_classes channels remain here, so this is a negligible fraction
    # of total bytes; three tiny 1-D matmuls — no dense kron matrix.
    # TODO(synk): could be moved into a third Pallas kernel with D-axis halo tiling.
    z = z[:, :, :S_h].reshape(N, num_classes, Dh, Hh, Wh)
    md = jnp.asarray(_interp_matrix_1d(Dl, Dh), jnp.float32)
    mh = jnp.asarray(_interp_matrix_1d(Hl, Hh), jnp.float32)
    mw = jnp.asarray(_interp_matrix_1d(Wl, Wh), jnp.float32)
    z = jnp.einsum("od,ncdhw->ncohw", md, z)
    z = jnp.einsum("ph,ncdhw->ncdpw", mh, z)
    z = jnp.einsum("qw,ncdhw->ncdhq", mw, z)
    zup_f = z.reshape(N, num_classes, S_l)

    # ---- kernel 2: low classifier + add + merged bias -----------------------
    tile_l, S_l_pad = _spatial_tile(S_l, tile_target)
    low_f = _pad_last(low.reshape(N, C_low, S_l), S_l_pad).astype(cdt)
    zup_f = _pad_last(zup_f, S_l_pad)
    bias = (params["b_low"] + params["b_high"])[:, None].astype(jnp.float32)

    out = pl.pallas_call(
        _low_cls_add_kernel,
        out_shape=jax.ShapeDtypeStruct((N, num_classes, S_l_pad), low.dtype),
        grid=(N, S_l_pad // tile_l),
        in_specs=[
            pl.BlockSpec((1, C_low, tile_l), lambda n, t: (n, 0, t)),
            pl.BlockSpec((1, num_classes, tile_l), lambda n, t: (n, 0, t)),
            pl.BlockSpec((num_classes, C_low), lambda n, t: (0, 0)),
            pl.BlockSpec((num_classes, 1), lambda n, t: (0, 0)),
        ],
        out_specs=pl.BlockSpec((1, num_classes, tile_l), lambda n, t: (n, 0, t)),
        compiler_params=pltpu.CompilerParams(
            dimension_semantics=("parallel", "parallel")),
    )(low_f, zup_f, params["w_low"].astype(cdt), bias)

    return out[:, :, :S_l].reshape(N, num_classes, Dl, Hl, Wl)


# ---------------------------------------------------------------------------
# Pure-JAX reference in the *original* PyTorch op order (validates the folding
# / reordering done inside the Pallas path).
# ---------------------------------------------------------------------------
def _reference_forward(low, high, params):
    N, C_low, Dl, Hl, Wl = low.shape
    _, C_high, Dh, Hh, Wh = high.shape

    eps = 1e-5
    bn_scale = params["bn_gamma"] / jnp.sqrt(params["bn_var"] + eps)
    bn_shift = params["bn_beta"] - params["bn_mean"] * bn_scale

    # cbr: 1x1 conv (no bias) -> BN -> ReLU
    x = jnp.einsum("oc,ncdhw->nodhw", params["w_cbr"], high)
    x = x * bn_scale[None, :, None, None, None] + bn_shift[None, :, None, None, None]
    x = jnp.maximum(x, 0.0)

    # scale: AdaptiveAvgPool3d(1) -> 1x1 conv -> sigmoid
    pooled = jnp.mean(high, axis=(2, 3, 4))
    s = jax.nn.sigmoid(pooled @ params["w_scale"].T)
    x = x * s[:, :, None, None, None]

    # trilinear upsample (align_corners=False), separable
    md = jnp.asarray(_interp_matrix_1d(Dl, Dh), jnp.float32)
    mh = jnp.asarray(_interp_matrix_1d(Hl, Hh), jnp.float32)
    mw = jnp.asarray(_interp_matrix_1d(Wl, Wh), jnp.float32)
    x = jnp.einsum("od,ncdhw->ncohw", md, x)
    x = jnp.einsum("ph,ncdhw->ncdpw", mh, x)
    x = jnp.einsum("qw,ncdhw->ncdhq", mw, x)

    out = (jnp.einsum("kc,ncdhw->nkdhw", params["w_low"], low)
           + params["b_low"][None, :, None, None, None]
           + jnp.einsum("kc,ncdhw->nkdhw", params["w_high"], x)
           + params["b_high"][None, :, None, None, None])
    return out


# ---------------------------------------------------------------------------
if __name__ == "__main__":
    N = 2
    low_channels, high_channels = 4, 8
    inter_channels, num_classes = 16, 3
    low_spatial = (8, 8, 8)
    high_spatial = (4, 4, 4)

    key = jax.random.PRNGKey(0)
    ks = jax.random.split(key, 10)

    low = jax.random.normal(ks[0], (N, low_channels) + low_spatial, jnp.float32)
    high = jax.random.normal(ks[1], (N, high_channels) + high_spatial, jnp.float32)

    # PyTorch-style (C_out, C_in) 1x1x1 conv weights.
    params = {
        "w_cbr":    0.1 * jax.random.normal(ks[2], (inter_channels, high_channels), jnp.float32),
        "bn_gamma": 1.0 + 0.1 * jax.random.normal(ks[3], (inter_channels,), jnp.float32),
        "bn_beta":  0.1 * jax.random.normal(ks[4], (inter_channels,), jnp.float32),
        "bn_mean":  0.1 * jax.random.normal(ks[5], (inter_channels,), jnp.float32),
        "bn_var":   0.5 + jnp.abs(jax.random.normal(ks[6], (inter_channels,), jnp.float32)),
        "w_scale":  0.1 * jax.random.normal(ks[7], (inter_channels, high_channels), jnp.float32),
        "w_low":    0.1 * jax.random.normal(ks[8], (num_classes, low_channels), jnp.float32),
        "b_low":    0.01 * jnp.arange(num_classes, dtype=jnp.float32),
        "w_high":   0.1 * jax.random.normal(ks[9], (num_classes, inter_channels), jnp.float32),
        "b_high":   0.02 * jnp.arange(num_classes, dtype=jnp.float32),
    }

    out = jax.block_until_ready(lraspp_head_forward(low, high, params))
    ref = jax.block_until_ready(_reference_forward(low, high, params))

    assert out.shape == (N, num_classes) + low_spatial, out.shape
    np.testing.assert_allclose(np.asarray(out), np.asarray(ref), atol=2e-4, rtol=2e-4)

    print("KERNEL_OK")
</pallas_src>

<mosaic_0001>
module attributes {stable_mosaic.version = 11 : i64} {
  func.func @_cbr_gate_cls_kernel(%arg0: i32, %arg1: i32, %arg2: memref<1x8x64xf32, #tpu.memory_space<vmem>>, %arg3: memref<16x8xf32, #tpu.memory_space<vmem>>, %arg4: memref<16x1xf32, #tpu.memory_space<vmem>>, %arg5: memref<1x3x16xf32, #tpu.memory_space<vmem>>, %arg6: memref<1x3x64xf32, #tpu.memory_space<vmem>>) attributes {dimension_semantics = [#tpu.dimension_semantics<parallel>, #tpu.dimension_semantics<parallel>], iteration_bounds = array<i64: 2, 1>, scalar_prefetch = 0 : i64, scratch_operands = 0 : i64, tpu.core_type = #tpu.core_type<tc>, window_params = [{transform_indices = @transform_0, window_bounds = array<i64: 1, 8, 64>}, {pipeline_mode = #tpu.pipeline_mode<synchronous>, transform_indices = @transform_1, window_bounds = array<i64: 16, 8>}, {pipeline_mode = #tpu.pipeline_mode<synchronous>, transform_indices = @transform_2, window_bounds = array<i64: 16, 1>}, {transform_indices = @transform_3, window_bounds = array<i64: 1, 3, 16>}, {transform_indices = @transform_4, window_bounds = array<i64: 1, 3, 64>}]} {
    %c0 = arith.constant 0 : index
    %c0_0 = arith.constant 0 : index
    %c0_1 = arith.constant 0 : index
    %0 = vector.load %arg2[%c0, %c0_0, %c0_1] : memref<1x8x64xf32, #tpu.memory_space<vmem>>, vector<1x8x64xf32>
    %1 = vector.shape_cast %0 : vector<1x8x64xf32> to vector<8x64xf32>
    %c0_2 = arith.constant 0 : index
    %c0_3 = arith.constant 0 : index
    %2 = vector.load %arg3[%c0_2, %c0_3] : memref<16x8xf32, #tpu.memory_space<vmem>>, vector<16x8xf32>
    %cst = arith.constant dense<0.000000e+00> : vector<16x64xf32>
    %3 = tpu.matmul %2, %1, %cst {dimension_numbers = #tpu.dot_dimension_numbers<[1], [0], [0], [1], [0, 0, 1, 1], [], []>} : vector<16x8xf32>, vector<8x64xf32>, vector<16x64xf32> -> vector<16x64xf32>
    %c0_4 = arith.constant 0 : index
    %c0_5 = arith.constant 0 : index
    %4 = vector.load %arg4[%c0_4, %c0_5] : memref<16x1xf32, #tpu.memory_space<vmem>>, vector<16x1xf32>
    %5 = vector.broadcast %4 : vector<16x1xf32> to vector<16x64xf32>
    %6 = arith.addf %3, %5 : vector<16x64xf32>
    %cst_6 = arith.constant 0.000000e+00 : f32
    %7 = vector.broadcast %cst_6 : f32 to vector<16x64xf32>
    %8 = arith.maximumf %6, %7 : vector<16x64xf32>
    %c0_7 = arith.constant 0 : index
    %c0_8 = arith.constant 0 : index
    %c0_9 = arith.constant 0 : index
    %9 = vector.load %arg5[%c0_7, %c0_8, %c0_9] : memref<1x3x16xf32, #tpu.memory_space<vmem>>, vector<1x3x16xf32>
    %10 = vector.shape_cast %9 : vector<1x3x16xf32> to vector<3x16xf32>
    %cst_10 = arith.constant dense<0.000000e+00> : vector<3x64xf32>
    %11 = tpu.matmul %10, %8, %cst_10 {dimension_numbers = #tpu.dot_dimension_numbers<[1], [0], [0], [1], [0, 0, 1, 1], [], []>} : vector<3x16xf32>, vector<16x64xf32>, vector<3x64xf32> -> vector<3x64xf32>
    %c0_11 = arith.constant 0 : index
    %c0_12 = arith.constant 0 : index
    %c0_13 = arith.constant 0 : index
    %12 = vector.load %arg6[%c0_11, %c0_12, %c0_13] : memref<1x3x64xf32, #tpu.memory_space<vmem>>, vector<1x3x64xf32>
    %13 = vector.shape_cast %12 : vector<1x3x64xf32> to vector<3x64xf32>
    %14 = vector.shape_cast %11 : vector<3x64xf32> to vector<1x3x64xf32>
    tpu.vector_store %arg6[%c0_11, %c0_12, %c0_13], %14 {strides = array<i32>} : memref<1x3x64xf32, #tpu.memory_space<vmem>>, vector<1x3x64xf32>,
    return
  }
  func.func @transform_0(%arg0: i32, %arg1: i32) -> (i32, i32, i32) {
    %c0_i32 = arith.constant 0 : i32
    %c0_i32_0 = arith.constant 0 : i32
    return %arg0, %c0_i32, %arg1 : i32, i32, i32
  }
  func.func @transform_1(%arg0: i32, %arg1: i32) -> (i32, i32) {
    %c0_i32 = arith.constant 0 : i32
    %c0_i32_0 = arith.constant 0 : i32
    %c0_i32_1 = arith.constant 0 : i32
    return %c0_i32, %c0_i32_0 : i32, i32
  }
  func.func @transform_2(%arg0: i32, %arg1: i32) -> (i32, i32) {
    %c0_i32 = arith.constant 0 : i32
    %c0_i32_0 = arith.constant 0 : i32
    %c0_i32_1 = arith.constant 0 : i32
    return %c0_i32, %c0_i32_0 : i32, i32
  }
  func.func @transform_3(%arg0: i32, %arg1: i32) -> (i32, i32, i32) {
    %c0_i32 = arith.constant 0 : i32
    %c0_i32_0 = arith.constant 0 : i32
    %c0_i32_1 = arith.constant 0 : i32
    return %arg0, %c0_i32, %c0_i32_0 : i32, i32, i32
  }
  func.func @transform_4(%arg0: i32, %arg1: i32) -> (i32, i32, i32) {
    %c0_i32 = arith.constant 0 : i32
    %c0_i32_0 = arith.constant 0 : i32
    return %arg0, %c0_i32, %arg1 : i32, i32, i32
  }
}

</mosaic_0001>

<bundles_post_ra>
// kernel: tpu_custom_call.1
= control target key start
LH: loop header
LB: loop body
LE: loop exit
PB: predicated region body
PF: predicated region fallthrough
CT: control target
= control target key end

     0   :  { %s614_s15 = smov 0   ;;  %s616_s16 = smov 0   ;;  %s666_s0 = inlined_call_operand.vmem [shape: f32[2,8,64], index: 0, kind: input, shape index: {}]   ;;  %s667_s1 = inlined_call_operand.vmem [shape: f32[16,8], index: 1, kind: input, shape index: {}]   ;;  %s668_s2 = inlined_call_operand.vmem [shape: f32[16,1], index: 2, kind: input, shape index: {}]   ;;  %s669_s3 = inlined_call_operand.vmem [shape: f32[2,3,16], index: 3, kind: input, shape index: {}]   ;;  %s670_s4 = inlined_call_operand.vmem [shape: f32[2,3,64], index: 4, kind: output, shape index: {}]  }
   0x1   :  { %s618_s17 = smov 0  }
   0x2 LB: > { %s26_s18 = sadd.s32 1, %s580_s16  ;;  %p507_p0 = scmp.ge.s32.totalorder %s584_s17, 1  ;;  %s584_s17 = sphi %s618_s17, %s14_s17   ;;  %s580_s16 = sphi %s616_s16, %s672_s16   ;;  %s576_s15 = sphi %s614_s15, %s671_s15  }
   0x3   : > { %p28_p1 = scmp.ge.s32.totalorder %s26_s18, 2  ;;  %p189_p2 = scmp.lt.s32.totalorder %s584_s17, 3 }
   0x5   : > { %s674_s18 = smov (%p28_p1, %s26_s18), 0  ;;  %p190_p3 = pnand %p507_p0, %p189_p2 }
   0x6   : > { %p223_p4 = scmp.lt.s32.totalorder (!%p190_p3), %s576_s15, 1 }
   0x7   : > { %193 = sbr.rel (%p190_p3) target bundleno = 413 (0x19d), region = 36 }
   0xc   : > { %v242_v0 = vld [vmem:[%s667_s1] sm:$0xff]  ;;  %vm256_vm0 = vcmask 64512   ;;  %v245_v1 = vld [vmem:[%s668_s2 + $0x8] sm:$0xff]  ;;  %v586_v2 = vmov 0   ;;  %s676_s15 = smov (!%p223_p4, %s576_s15), 1  ;;  %v587_v6 = vmov 0.0  }
   0xd   : > { %524 = vmatprep.mubr.msk.f32.mxu0 %vm256_vm0, %v242_v0  ;;  %561 = vset.pattern.permute.xlu0 %v586_v2  ;;  %v244_v3 = vld [vmem:[%s668_s2] sm:$0xff]  ;;  %s508_s25 = sshll.u32 %s676_s15, 3  ;;  %v243_v5 = vld [vmem:[%s667_s1 + $0x8] sm:$0xff]  ;;  %vm588_vm1 = vmmov 0   ;;  %s509_s5 = sshll.u32 %s676_s15, 2  ;;  %vm341_vm2 = vcmask 130048  }
   0xe   : > { %253 = vperm.xlu0 %561, %v245_v1   ;;  %s229_s28 = scalar_lea.vmem %s666_s0, %s508_s25  ;;  %527 = vmatprep.subr.mxu1 %v587_v6  ;;  %s233_s8 = scalar_lea.vmem %s669_s3, %s509_s5  ;;  %vm415_vm3 = vcmask 518144  }
   0xf   : > { %v241_v4 = vld [vmem:[%s229_s28] sm:$0xff]  ;;  %531 = vmatprep.mubr.msk.f32.mxu1 %vm588_vm1, %v587_v6  ;;  %s240_s11 = scalar_lea.vmem %s670_s4, %s509_s5 }
  0x10   : > { %522 = vmatprep.subr.mxu0 %v241_v4  ;;  %v340_v15 = vld [vmem:[%s233_s8] sm:$0x7] }
  0x11   : > { %523 = vmatpush3.msra.mxu0 %v241_v4 }
  0x12   : > { %248 = vperm.xlu0 %561, %v244_v3   ;;  %525 = vmatmul.mubr.msk.f32.vlgmr.msra.gmra.mxu0 %vm256_vm0, %v243_v5 }
  0x89   : > { %v254_v7 = vpop.permute.xlu0 %253 }
  0x8d   : > { %v249_v10 = vpop.permute.xlu0 %248 }
  0xd2   : > { %v526_v8 = vpop.f32.mrf.mxu0 }
  0xd3   : > { %v335_v9 = vadd.f32 %v526_v8, %v254_v7 }
  0xd4   : > { %v329_v11 = vpop.f32.mrf.mxu0 }
  0xd5   : > { %v339_v12 = vmax.f32 %v335_v9, 0.0  ;;  %v330_v13 = vadd.f32 %v329_v11, %v249_v10 }
  0xd7   : > { %v338_v14 = vmax.f32 %v330_v13, 0.0  ;;  %528 = vmatpush3.msra.mxu1 %v339_v12 }
  0xd8   : > { %529 = vmatprep.subr.mxu1 %v587_v6 }
  0xd9   : > { %530 = vmatpush3.msra.mxu1 %v338_v14 }
  0xda   : > { %532 = vmatmul.mubr.msk.f32.vlgmr.msra.gmra.mxu1 %vm341_vm2, %v340_v15 }
 0x19a   : > { %v411_v16 = vpop.f32.mrf.mxu1 }
 0x19b   : > { %416 = vst.msk [vmem:[%s240_s11] sm:$0x7] %vm415_vm3, %v411_v16 }
 0x19c   : > { %v533_v17 = vpop.f32.mrf.mxu1 }
 0x19d PF: > { %s14_s17 = sadd.s32 1, %s584_s17   ;;  %s671_s15 = smov %s580_s16 }
 0x19e   : > { %p11_p5 = scmp.ge.s32.totalorder %s14_s17, 4   ;;  %s672_s16 = smov %s674_s18 }
 0x1a0   :  { %13 = sbr.rel (!%p11_p5) target bundleno = 2 (0x2), region = 69 }

</bundles_post_ra>
